<compile_context>
chip_gen: v7x
topology: tpu7x:2x2x1
jax: 0.10.0
libtpu: 0.0.40
codegen_flags: <defaults>
</compile_context>

<pallas_src>
import jax
import jax.numpy as jnp
from jax.experimental import pallas as pl
from jax.experimental.pallas import tpu as pltpu


def mlp_kernel(x_ref, w1_ref, b1_ref, w2_ref, b2_ref, o_ref):
    # Cast the streamed x tile to the matmul dtype in-register (no padded or
    # pre-cast HBM copy of x is ever materialized).
    x = x_ref[...].astype(w1_ref.dtype)
    # Layer 1: MXU matmul with f32 accumulation; f32 bias + ReLU on the VPU.
    h = jnp.dot(x, w1_ref[...], preferred_element_type=jnp.float32)
    h = jnp.maximum(h + b1_ref[...], 0.0)          # b1 is (1, H) -> broadcasts
    # Layer 2: deliberate cast of activations to the weight dtype (bf16 path;
    # no-op in the f32 path), f32 accumulation, f32 bias, unpadded store.
    out = jnp.dot(h.astype(w2_ref.dtype), w2_ref[...],
                  preferred_element_type=jnp.float32)
    o_ref[...] = (out + b2_ref[...]).astype(o_ref.dtype)   # b2 is (1, C)


def _round_up(x: int, m: int) -> int:
    return ((x + m - 1) // m) * m


def prepare_params(w1, b1, w2, b2, *, use_bf16: bool = True):
    """One-time parameter prep, hoisted out of the per-call path.

    Casts weights to the matmul dtype (bf16 for the fast path, f32 for the
    exact path) and reshapes biases to 2-D rows. Do this once and reuse the
    result for every forward call.
    """
    mm = jnp.bfloat16 if use_bf16 else jnp.float32
    return (w1.astype(mm),
            b1.astype(jnp.float32).reshape(1, -1),
            w2.astype(mm),
            b2.astype(jnp.float32).reshape(1, -1))


def mlp_forward(x, w1, b1, w2, b2, *, block_batch: int = 512):
    """Fused MLP forward.

    x:  [B, n_feat] (any float dtype; cast to w1.dtype inside the kernel)
    w1: [n_feat, H], b1: [H] or [1, H]
    w2: [H, C],      b2: [C] or [1, C]
    The weight dtype selects the matmul precision. Returns [B, C] float32.
    """
    B, F = x.shape
    F2, H = w1.shape
    H2, C = w2.shape
    assert F == F2 and H == H2, "weight shapes inconsistent with x"

    # Cheap defensive reshape (no-op if prepare_params was used).
    b1 = b1.astype(jnp.float32).reshape(1, H)
    b2 = b2.astype(jnp.float32).reshape(1, C)

    # Batch tile: round the user-supplied block_batch itself to a multiple of
    # 8 sublanes (f32 x / out tiles), never larger than the rounded batch.
    block_batch = max(8, _round_up(block_batch, 8))
    TB = min(block_batch, _round_up(B, 8))
    grid = (pl.cdiv(B, TB),)   # ragged last block is masked by Pallas

    # Explicit VMEM budget: resident weights/biases (conservatively assume the
    # pipeline double-buffers them) + double-buffered x/out tiles + headroom.
    wbytes = w1.dtype.itemsize
    resident = 2 * (F * H + H * C) * wbytes + 2 * (H + C) * 4
    streamed = 2 * TB * F * x.dtype.itemsize + 2 * TB * C * 4
    vmem_limit = int(min(max(resident + streamed + (4 << 20), 32 << 20),
                         96 << 20))

    return pl.pallas_call(
        mlp_kernel,
        out_shape=jax.ShapeDtypeStruct((B, C), jnp.float32),
        grid_spec=pltpu.PrefetchScalarGridSpec(
            num_scalar_prefetch=0,
            grid=grid,
            in_specs=[
                # x tile streams over the batch grid axis (unpadded last dim).
                pl.BlockSpec((TB, F), lambda i: (i, 0)),
                # Weights / biases: constant index_map, full-shape blocks ->
                # DMA'd once, resident in VMEM for every grid step.
                pl.BlockSpec((F, H), lambda i: (0, 0)),
                pl.BlockSpec((1, H), lambda i: (0, 0)),
                pl.BlockSpec((H, C), lambda i: (0, 0)),
                pl.BlockSpec((1, C), lambda i: (0, 0)),
            ],
            # Unpadded (TB, C) output tile: tiny HBM writeback stream (masked
            # narrow store beats 64x write amplification for class_no=2).
            out_specs=pl.BlockSpec((TB, C), lambda i: (i, 0)),
        ),
        compiler_params=pltpu.CompilerParams(
            dimension_semantics=("parallel",),   # megacore-shard batch tiles
            vmem_limit_bytes=vmem_limit,
        ),
    )(x, w1, b1, w2, b2)


def init_params(key, n_feat, hidden1, class_no):
    """Deterministic init mimicking nn.Linear's uniform(-1/sqrt(fan_in), 1/sqrt(fan_in))."""
    k1, k2, k3, k4 = jax.random.split(key, 4)
    bound1 = 1.0 / jnp.sqrt(n_feat)
    bound2 = 1.0 / jnp.sqrt(hidden1)
    w1 = jax.random.uniform(k1, (n_feat, hidden1), jnp.float32, -bound1, bound1)
    b1 = jax.random.uniform(k2, (hidden1,), jnp.float32, -bound1, bound1)
    w2 = jax.random.uniform(k3, (hidden1, class_no), jnp.float32, -bound2, bound2)
    b2 = jax.random.uniform(k4, (class_no,), jnp.float32, -bound2, bound2)
    return w1, b1, w2, b2


if __name__ == "__main__":
    # Small shapes consistent with the module's forward: x is [batch, n_feat].
    batch, n_feat, hidden1, class_no = 8, 32, 64, 2

    key = jax.random.PRNGKey(0)
    kx, kp, kx2 = jax.random.split(key, 3)
    x = jax.random.normal(kx, (batch, n_feat), jnp.float32)
    w1, b1, w2, b2 = init_params(kp, n_feat, hidden1, class_no)

    # Pure-JAX reference (same math as the PyTorch forward, f32).
    ref = jnp.maximum(x @ w1 + b1, 0.0) @ w2 + b2

    # 1) Exactness check: f32 operand path must match the reference tightly.
    p_f32 = prepare_params(w1, b1, w2, b2, use_bf16=False)
    out_f32 = jax.block_until_ready(mlp_forward(x, *p_f32))
    assert out_f32.shape == (batch, class_no)
    assert jnp.allclose(out_f32, ref, atol=1e-5, rtol=1e-5)

    # 2) Performance path: bf16 MXU operands, f32 accumulation (looser tol).
    p_bf16 = prepare_params(w1, b1, w2, b2, use_bf16=True)
    out_bf16 = jax.block_until_ready(mlp_forward(x, *p_bf16))
    assert out_bf16.shape == (batch, class_no)
    assert jnp.allclose(out_bf16, ref, atol=5e-2, rtol=5e-2)

    # 3) Ragged batch + multi-step grid (exercises pl.cdiv grid, masked last
    #    block, and streaming x / resident weights across several steps).
    x2 = jax.random.normal(kx2, (40, n_feat), jnp.float32)
    ref2 = jnp.maximum(x2 @ w1 + b1, 0.0) @ w2 + b2
    out2 = jax.block_until_ready(mlp_forward(x2, *p_f32, block_batch=16))
    assert out2.shape == (40, class_no)
    assert jnp.allclose(out2, ref2, atol=1e-5, rtol=1e-5)

    print("KERNEL_OK")
</pallas_src>

<mosaic_0001>
module attributes {stable_mosaic.version = 11 : i64} {
  func.func @mlp_kernel(%arg0: i32, %arg1: memref<8x32xf32, #tpu.memory_space<vmem>>, %arg2: memref<32x64xf32, #tpu.memory_space<vmem>>, %arg3: memref<1x64xf32, #tpu.memory_space<vmem>>, %arg4: memref<64x2xf32, #tpu.memory_space<vmem>>, %arg5: memref<1x2xf32, #tpu.memory_space<vmem>>, %arg6: memref<8x2xf32, #tpu.memory_space<vmem>>) attributes {dimension_semantics = [#tpu.dimension_semantics<parallel>], iteration_bounds = array<i64: 1>, scalar_prefetch = 0 : i64, scratch_operands = 0 : i64, tpu.core_type = #tpu.core_type<tc>, window_params = [{transform_indices = @transform_0, window_bounds = array<i64: 8, 32>}, {pipeline_mode = #tpu.pipeline_mode<synchronous>, transform_indices = @transform_1, window_bounds = array<i64: 32, 64>}, {pipeline_mode = #tpu.pipeline_mode<synchronous>, transform_indices = @transform_2, window_bounds = array<i64: 1, 64>}, {pipeline_mode = #tpu.pipeline_mode<synchronous>, transform_indices = @transform_3, window_bounds = array<i64: 64, 2>}, {pipeline_mode = #tpu.pipeline_mode<synchronous>, transform_indices = @transform_4, window_bounds = array<i64: 1, 2>}, {transform_indices = @transform_5, window_bounds = array<i64: 8, 2>}]} {
    %c0 = arith.constant 0 : index
    %c0_0 = arith.constant 0 : index
    %0 = vector.load %arg1[%c0, %c0_0] : memref<8x32xf32, #tpu.memory_space<vmem>>, vector<8x32xf32>
    %c0_1 = arith.constant 0 : index
    %c0_2 = arith.constant 0 : index
    %1 = vector.load %arg2[%c0_1, %c0_2] : memref<32x64xf32, #tpu.memory_space<vmem>>, vector<32x64xf32>
    %cst = arith.constant dense<0.000000e+00> : vector<8x64xf32>
    %2 = tpu.matmul %0, %1, %cst {dimension_numbers = #tpu.dot_dimension_numbers<[1], [0], [0], [1], [0, 0, 1, 1], [], []>} : vector<8x32xf32>, vector<32x64xf32>, vector<8x64xf32> -> vector<8x64xf32>
    %c0_3 = arith.constant 0 : index
    %c0_4 = arith.constant 0 : index
    %3 = vector.load %arg3[%c0_3, %c0_4] : memref<1x64xf32, #tpu.memory_space<vmem>>, vector<1x64xf32>
    %4 = vector.broadcast %3 : vector<1x64xf32> to vector<8x64xf32>
    %5 = arith.addf %2, %4 : vector<8x64xf32>
    %cst_5 = arith.constant 0.000000e+00 : f32
    %6 = vector.broadcast %cst_5 : f32 to vector<8x64xf32>
    %7 = arith.maximumf %5, %6 : vector<8x64xf32>
    %c0_6 = arith.constant 0 : index
    %c0_7 = arith.constant 0 : index
    %8 = vector.load %arg4[%c0_6, %c0_7] : memref<64x2xf32, #tpu.memory_space<vmem>>, vector<64x2xf32>
    %cst_8 = arith.constant dense<0.000000e+00> : vector<8x2xf32>
    %9 = tpu.matmul %7, %8, %cst_8 {dimension_numbers = #tpu.dot_dimension_numbers<[1], [0], [0], [1], [0, 0, 1, 1], [], []>} : vector<8x64xf32>, vector<64x2xf32>, vector<8x2xf32> -> vector<8x2xf32>
    %c0_9 = arith.constant 0 : index
    %c0_10 = arith.constant 0 : index
    %10 = vector.load %arg5[%c0_9, %c0_10] : memref<1x2xf32, #tpu.memory_space<vmem>>, vector<1x2xf32>
    %11 = vector.broadcast %10 : vector<1x2xf32> to vector<8x2xf32>
    %12 = arith.addf %9, %11 : vector<8x2xf32>
    %c0_11 = arith.constant 0 : index
    %c0_12 = arith.constant 0 : index
    %13 = vector.load %arg6[%c0_11, %c0_12] : memref<8x2xf32, #tpu.memory_space<vmem>>, vector<8x2xf32>
    tpu.vector_store %arg6[%c0_11, %c0_12], %12 {strides = array<i32>} : memref<8x2xf32, #tpu.memory_space<vmem>>, vector<8x2xf32>,
    return
  }
  func.func @transform_0(%arg0: i32) -> (i32, i32) {
    %c0_i32 = arith.constant 0 : i32
    %c0_i32_0 = arith.constant 0 : i32
    return %arg0, %c0_i32 : i32, i32
  }
  func.func @transform_1(%arg0: i32) -> (i32, i32) {
    %c0_i32 = arith.constant 0 : i32
    %c0_i32_0 = arith.constant 0 : i32
    %c0_i32_1 = arith.constant 0 : i32
    return %c0_i32, %c0_i32_0 : i32, i32
  }
  func.func @transform_2(%arg0: i32) -> (i32, i32) {
    %c0_i32 = arith.constant 0 : i32
    %c0_i32_0 = arith.constant 0 : i32
    %c0_i32_1 = arith.constant 0 : i32
    return %c0_i32, %c0_i32_0 : i32, i32
  }
  func.func @transform_3(%arg0: i32) -> (i32, i32) {
    %c0_i32 = arith.constant 0 : i32
    %c0_i32_0 = arith.constant 0 : i32
    %c0_i32_1 = arith.constant 0 : i32
    return %c0_i32, %c0_i32_0 : i32, i32
  }
  func.func @transform_4(%arg0: i32) -> (i32, i32) {
    %c0_i32 = arith.constant 0 : i32
    %c0_i32_0 = arith.constant 0 : i32
    %c0_i32_1 = arith.constant 0 : i32
    return %c0_i32, %c0_i32_0 : i32, i32
  }
  func.func @transform_5(%arg0: i32) -> (i32, i32) {
    %c0_i32 = arith.constant 0 : i32
    %c0_i32_0 = arith.constant 0 : i32
    return %arg0, %c0_i32 : i32, i32
  }
}

</mosaic_0001>

<bundles_post_ra>
// kernel: tpu_custom_call.1
= control target key start
LH: loop header
LB: loop body
LE: loop exit
PB: predicated region body
PF: predicated region fallthrough
CT: control target
= control target key end

     0   :  { %v271_v0 = vmov 0.0|0.0   ;;  %vm272_vm0 = vmmov 0   ;;  %v273_v4 = vmov 0.0   ;;  %vm32_vm1 = vcmask 261120   ;;  %s352_s1 = inlined_call_operand.vmem [shape: f32[32,64], index: 1, kind: input, shape index: {}]   ;;  %s353_s3 = inlined_call_operand.vmem [shape: f32[64,2], index: 3, kind: input, shape index: {}]   ;;  %s354_s0 = inlined_call_operand.vmem [shape: f32[8,32], index: 0, kind: input, shape index: {}]   ;;  %s355_s2 = inlined_call_operand.vmem [shape: f32[1,64], index: 2, kind: input, shape index: {}]   ;;  %s356_s4 = inlined_call_operand.vmem [shape: f32[1,2], index: 4, kind: input, shape index: {}]   ;;  %s357_s5 = inlined_call_operand.vmem [shape: f32[8,2], index: 5, kind: output, shape index: {}]  }
   0x1   :  { %250 = vmatprep.subr.bf16.mxu0 %v271_v0  ;;  %v21_v1 = vld [vmem:[%s352_s1] sm:$0xff]  ;;  %v22_v2 = vld [vmem:[%s352_s1 + $0x8] sm:$0xff]  ;;  %v23_v3 = vld [vmem:[%s352_s1 + $0x10] sm:$0xff]  ;;  %228 = vmatprep.mubr.msk.f32.mxu0 %vm272_vm0, %v273_v4  ;;  %vm122_vm2 = vcmask 523264   ;;  %vm196_vm3 = vcmask 15360  }
   0x2   :  { %v251_v5 = vpack.c.bf16 %v22_v2, %v21_v1  ;;  %v24_v6 = vld [vmem:[%s352_s1 + $0x18] sm:$0xff]  ;;  %256 = vmatprep.subr.bf16.mxu1 %v271_v0  ;;  %v107_v7 = vld [vmem:[%s353_s3] sm:$0xff]  ;;  %247 = vmatprep.mubr.msk.f32.mxu1 %vm272_vm0, %v273_v4  ;;  %v108_v8 = vld [vmem:[%s353_s3 + $0x8] sm:$0xff] }
   0x3   :  { %v109_v9 = vld [vmem:[%s353_s3 + $0x10] sm:$0xff]  ;;  %v110_v10 = vld [vmem:[%s353_s3 + $0x18] sm:$0xff]  ;;  %v254_v11 = vpack.c.bf16 %v24_v6, %v23_v3  ;;  %v257_v12 = vpack.c.bf16 %v108_v8, %v107_v7  ;;  %v111_v14 = vld [vmem:[%s353_s3 + $0x20] sm:$0xff] }
   0x4   :  { %252 = vmatpush3.bf16.msra.mxu0 %v251_v5  ;;  %v260_v13 = vpack.c.bf16 %v110_v10, %v109_v9  ;;  %v112_v15 = vld [vmem:[%s353_s3 + $0x28] sm:$0xff]  ;;  %v20_v16 = vld [vmem:[%s354_s0] sm:$0xff]  ;;  %v113_v18 = vld [vmem:[%s353_s3 + $0x30] sm:$0xff] }
   0x5   :  { %253 = vmatprep.subr.bf16.mxu0 %v271_v0  ;;  %258 = vmatpush3.bf16.msra.mxu1 %v257_v12  ;;  %v263_v17 = vpack.c.bf16 %v112_v15, %v111_v14  ;;  %v114_v19 = vld [vmem:[%s353_s3 + $0x38] sm:$0xff]  ;;  %v202_v21 = vld [vmem:[%s355_s2] ss:$0 sm:$0xff] }
   0x6   :  { %259 = vmatprep.subr.bf16.mxu1 %v271_v0  ;;  %v266_v20 = vpack.c.bf16 %v114_v19, %v113_v18  ;;  %v204_v26 = vld [vmem:[%s356_s4] ss:$0 sm:$0xff] }
   0x8   :  { %255 = vmatpush3.bf16.msra.mxu0 %v254_v11 }
   0x9   :  { %261 = vmatpush3.bf16.msra.mxu1 %v260_v13 }
   0xa   :  { %262 = vmatprep.subr.bf16.mxu1 %v271_v0 }
   0xb   :  { %229 = vmatmul.mubr.msk.f32.vlgmr.msra.gmra.mrb[0].mxu0 %vm32_vm1, %v20_v16 }
   0xd   :  { %264 = vmatpush3.bf16.msra.mxu1 %v263_v17 }
   0xe   :  { %265 = vmatprep.subr.bf16.mxu1 %v271_v0 }
  0x11   :  { %267 = vmatpush3.bf16.msra.mxu1 %v266_v20 }
  0xde   :  { %v102_v22 = vpop.f32.mrb[0].mxu0 }
  0xdf   :  { %v103_v23 = vadd.f32 %v202_v21, %v102_v22  ;;  %v230_v24 = vpop.f32.mrb[1].mxu0 }
  0xe1   :  { %v106_v25 = vmax.f32 %v103_v23, 0.0 }
  0xe3   :  { %248 = vmatmul.mubr.msk.f32.vlgmr.msra.gmra.mrb[0].mxu1 %vm122_vm2, %v106_v25 }
 0x1b6   :  { %v192_v27 = vpop.f32.mrb[0].mxu1 }
 0x1b7   :  { %v193_v28 = vadd.f32 %v204_v26, %v192_v27  ;;  %v249_v29 = vpop.f32.mrb[1].mxu1 }
 0x1b9   :  { %197 = vst.msk [vmem:[%s357_s5] sm:$0xff] %vm196_vm3, %v193_v28 }

</bundles_post_ra>
